<compile_context>
chip_gen: v7x
topology: tpu7x:2x2x1
jax: 0.10.0
libtpu: 0.0.40
codegen_flags: <defaults>
</compile_context>

<pallas_src>
import functools

import jax
import jax.numpy as jnp
import numpy as np
from jax import lax
from jax.experimental import pallas as pl
from jax.experimental.pallas import tpu as pltpu


def rnn_linear_kernel(x_ref,      # ((T+1)*B, I)  time-major; last block is zeros
                      wih0_ref,   # (I, 2H)       [W_ih0 | 0]
                      bias2_ref,  # (1, 2H)       [b_ih0+b_hh0 | b_ih1+b_hh1]
                      wrec_ref,   # (2H, 2H)      [[W_hh0, W_ih1], [0, W_hh1]]
                      wout2_ref,  # (2H, O_pad)   rows 0:H are zero, rows H:2H = W_out
                      bout_ref,   # (1, O_pad)
                      out_ref,    # (B, O_pad)
                      *, T, B, H):
    # Hoisted layer-0 projection for ALL T+1 time blocks in ONE MXU call,
    # with both layers' summed biases folded in (layer-1 columns of the
    # projection weight are zero, so the layer-1 half is just b1 per row).
    x_proj = (jnp.dot(x_ref[...], wih0_ref[...],
                      preferred_element_type=jnp.float32)
              + bias2_ref[...])                                # ((T+1)*B, 2H)

    wrec = wrec_ref[...]                                       # (2H, 2H)

    # --- Prime step (s = 0): carry = [h0_0 | h1_{-1}=0].  The layer-1 half
    # must be forced to zero here (otherwise tanh(b1) would leak into h1_0).
    lane = lax.broadcasted_iota(jnp.int32, (B, 2 * H), 1)
    carry = jnp.where(lane < H, jnp.tanh(x_proj[:B, :]), 0.0)  # (B, 2H)

    # --- Skewed steps s = 1..T: one dot + one tanh each, no concat/slice.
    # At step s the carry becomes [h0_s | h1_{s-1}].  Step s = T consumes the
    # trailing zero input block and yields h1_{T-1} in the layer-1 half.
    for s in range(1, T + 1):
        carry = jnp.tanh(x_proj[s * B:(s + 1) * B, :]
                         + jnp.dot(carry, wrec,
                                   preferred_element_type=jnp.float32))

    # Linear head: zero rows 0:H of wout2 exactly cancel the (finite) garbage
    # in the layer-0 half of the final carry; lane-dense padded output store.
    out_ref[...] = (jnp.dot(carry, wout2_ref[...],
                            preferred_element_type=jnp.float32)
                    + bout_ref[...])


def prepare_params(p):
    """One-time packing of weights (runs once, NOT on the per-call path)."""
    I, H = p["w_ih0_T"].shape
    O = p["b_out"].shape[-1]
    O_pad = ((O + 127) // 128) * 128

    # [W_ih0 | 0] so a single matmul produces the layer-0 projection in the
    # left half and (with the packed bias) b1 in the right half.
    wih0_pad = jnp.zeros((I, 2 * H), jnp.float32).at[:, :H].set(p["w_ih0_T"])

    bias2 = jnp.concatenate([p["b_ih0"] + p["b_hh0"],
                             p["b_ih1"] + p["b_hh1"]], axis=-1)   # (1, 2H)

    # Fused skewed recurrent weight [[W_hh0, W_ih1], [0, W_hh1]].
    wrec = jnp.zeros((2 * H, 2 * H), jnp.float32)
    wrec = wrec.at[:H, :H].set(p["w_hh0_T"])
    wrec = wrec.at[:H, H:].set(p["w_ih1_T"])
    wrec = wrec.at[H:, H:].set(p["w_hh1_T"])

    # Padded head: top H rows zero (kill layer-0 half of final carry).
    wout2 = jnp.zeros((2 * H, O_pad), jnp.float32).at[H:, :O].set(p["w_out_T"])
    bout = jnp.zeros((1, O_pad), jnp.float32).at[:, :O].set(p["b_out"])

    return {"wih0_pad": wih0_pad, "bias2": bias2, "wrec": wrec,
            "wout2": wout2, "bout": bout}


@functools.partial(jax.jit, static_argnames=("out_size",))
def rnn_forward(x, packed, out_size):
    """x: (B, T, I) float32 (batch_first, like PyTorch). Returns (B, out_size)."""
    B, T, I = x.shape
    H2 = packed["wrec"].shape[0]          # 2H
    H = H2 // 2
    O_pad = packed["bout"].shape[-1]
    B_pad = ((B + 7) // 8) * 8            # full sublane groups -> aligned slices

    # Time-major, batch-padded, with ONE extra zero time block (trailing skew
    # step), flattened to a single 2-D slab ((T+1)*B_pad, I).
    x_slab = jnp.zeros((T + 1, B_pad, I), jnp.float32).at[:T, :B, :].set(
        jnp.transpose(x, (1, 0, 2)))
    x_slab = x_slab.reshape((T + 1) * B_pad, I)

    flops = (2 * (T + 1) * B_pad * I * H2          # hoisted layer-0 projection
             + 2 * T * B_pad * H2 * H2             # skewed recurrence
             + 2 * B_pad * H2 * O_pad)             # output head
    transcendentals = (T + 1) * B_pad * H2
    bytes_accessed = 4 * (x_slab.size + packed["wih0_pad"].size
                          + packed["bias2"].size + packed["wrec"].size
                          + packed["wout2"].size + packed["bout"].size
                          + B_pad * O_pad)

    kernel = functools.partial(rnn_linear_kernel, T=T, B=B_pad, H=H)
    vmem = pl.BlockSpec(memory_space=pltpu.MemorySpace.VMEM)
    out_p = pl.pallas_call(
        kernel,
        out_shape=jax.ShapeDtypeStruct((B_pad, O_pad), jnp.float32),
        in_specs=[vmem] * 6,
        out_specs=vmem,
        cost_estimate=pl.CostEstimate(flops=flops,
                                      transcendentals=transcendentals,
                                      bytes_accessed=bytes_accessed),
    )(x_slab, packed["wih0_pad"], packed["bias2"], packed["wrec"],
      packed["wout2"], packed["bout"])
    return out_p[:B, :out_size]


def make_params(key, input_size, hidden_size, output_size):
    """Deterministic init mimicking PyTorch's U(-1/sqrt(H), 1/sqrt(H))."""
    ks = jax.random.split(key, 11)
    bound = 1.0 / np.sqrt(hidden_size)
    u = lambda k, shape: jax.random.uniform(k, shape, jnp.float32, -bound, bound)
    return {
        # layer 0
        "w_ih0_T": u(ks[0], (input_size, hidden_size)),
        "w_hh0_T": u(ks[1], (hidden_size, hidden_size)),
        "b_ih0":   u(ks[2], (1, hidden_size)),
        "b_hh0":   u(ks[3], (1, hidden_size)),
        # layer 1
        "w_ih1_T": u(ks[4], (hidden_size, hidden_size)),
        "w_hh1_T": u(ks[5], (hidden_size, hidden_size)),
        "b_ih1":   u(ks[6], (1, hidden_size)),
        "b_hh1":   u(ks[7], (1, hidden_size)),
        # output linear
        "w_out_T": u(ks[8], (hidden_size, output_size)),
        "b_out":   u(ks[9], (1, output_size)),
    }


def reference_forward(x, p):
    """Pure-JAX reference (matches PyTorch nn.RNN + Linear semantics)."""
    B, T, _ = x.shape
    H = p["w_hh0_T"].shape[0]
    h0 = jnp.zeros((B, H), jnp.float32)
    h1 = jnp.zeros((B, H), jnp.float32)
    for t in range(T):
        xt = x[:, t, :]
        h0 = jnp.tanh(xt @ p["w_ih0_T"] + p["b_ih0"] + h0 @ p["w_hh0_T"] + p["b_hh0"])
        h1 = jnp.tanh(h0 @ p["w_ih1_T"] + p["b_ih1"] + h1 @ p["w_hh1_T"] + p["b_hh1"])
    return h1 @ p["w_out_T"] + p["b_out"]


if __name__ == "__main__":
    B, T, I, H, O = 2, 8, 4, 32, 16
    key = jax.random.PRNGKey(0)
    kx, kp = jax.random.split(key)
    x = jax.random.normal(kx, (B, T, I), jnp.float32)
    params = make_params(kp, I, H, O)

    packed = jax.tree_util.tree_map(jax.block_until_ready, prepare_params(params))

    out = rnn_forward(x, packed, O)
    out = jax.block_until_ready(out)

    ref = reference_forward(x, params)
    assert out.shape == (B, O)
    np.testing.assert_allclose(np.asarray(out), np.asarray(ref), rtol=1e-5, atol=1e-5)

    print("KERNEL_OK")
</pallas_src>

<mosaic_0001>
module attributes {stable_mosaic.version = 11 : i64} {
  func.func @rnn_linear_kernel(%arg0: memref<72x4xf32, #tpu.memory_space<vmem>>, %arg1: memref<4x64xf32, #tpu.memory_space<vmem>>, %arg2: memref<1x64xf32, #tpu.memory_space<vmem>>, %arg3: memref<64x64xf32, #tpu.memory_space<vmem>>, %arg4: memref<64x128xf32, #tpu.memory_space<vmem>>, %arg5: memref<1x128xf32, #tpu.memory_space<vmem>>, %arg6: memref<8x128xf32, #tpu.memory_space<vmem>>) attributes {dimension_semantics = [], scalar_prefetch = 0 : i64, scratch_operands = 0 : i64, tpu.core_type = #tpu.core_type<tc>} {
    %c0 = arith.constant 0 : index
    %c0_0 = arith.constant 0 : index
    %0 = vector.load %arg0[%c0, %c0_0] : memref<72x4xf32, #tpu.memory_space<vmem>>, vector<72x4xf32>
    %c0_1 = arith.constant 0 : index
    %c0_2 = arith.constant 0 : index
    %1 = vector.load %arg1[%c0_1, %c0_2] : memref<4x64xf32, #tpu.memory_space<vmem>>, vector<4x64xf32>
    %cst = arith.constant dense<0.000000e+00> : vector<72x64xf32>
    %2 = tpu.matmul %0, %1, %cst {dimension_numbers = #tpu.dot_dimension_numbers<[1], [0], [0], [1], [0, 0, 1, 1], [], []>} : vector<72x4xf32>, vector<4x64xf32>, vector<72x64xf32> -> vector<72x64xf32>
    %c0_3 = arith.constant 0 : index
    %c0_4 = arith.constant 0 : index
    %3 = vector.load %arg2[%c0_3, %c0_4] : memref<1x64xf32, #tpu.memory_space<vmem>>, vector<1x64xf32>
    %4 = vector.broadcast %3 : vector<1x64xf32> to vector<72x64xf32>
    %5 = arith.addf %2, %4 : vector<72x64xf32>
    %c0_5 = arith.constant 0 : index
    %c0_6 = arith.constant 0 : index
    %6 = vector.load %arg3[%c0_5, %c0_6] : memref<64x64xf32, #tpu.memory_space<vmem>>, vector<64x64xf32>
    %7 = tpu.iota {dimensions = array<i32: 1>} : vector<8x64xi32>
    %c32_i32 = arith.constant 32 : i32
    %8 = vector.broadcast %c32_i32 : i32 to vector<8x64xi32>
    %9 = arith.cmpi slt, %7, %8 : vector<8x64xi32>
    %10 = vector.extract_strided_slice %5 {offsets = [0, 0], sizes = [8, 64], strides = [1, 1]} : vector<72x64xf32> to vector<8x64xf32>
    %11 = math.tanh %10 : vector<8x64xf32>
    %cst_7 = arith.constant 0.000000e+00 : f32
    %12 = vector.broadcast %cst_7 : f32 to vector<8x64xf32>
    %13 = arith.select %9, %11, %12 : vector<8x64xi1>, vector<8x64xf32>
    %14 = vector.extract_strided_slice %5 {offsets = [8, 0], sizes = [8, 64], strides = [1, 1]} : vector<72x64xf32> to vector<8x64xf32>
    %cst_8 = arith.constant dense<0.000000e+00> : vector<8x64xf32>
    %15 = tpu.matmul %13, %6, %cst_8 {dimension_numbers = #tpu.dot_dimension_numbers<[1], [0], [0], [1], [0, 0, 1, 1], [], []>} : vector<8x64xf32>, vector<64x64xf32>, vector<8x64xf32> -> vector<8x64xf32>
    %16 = arith.addf %14, %15 : vector<8x64xf32>
    %17 = math.tanh %16 : vector<8x64xf32>
    %18 = vector.extract_strided_slice %5 {offsets = [16, 0], sizes = [8, 64], strides = [1, 1]} : vector<72x64xf32> to vector<8x64xf32>
    %cst_9 = arith.constant dense<0.000000e+00> : vector<8x64xf32>
    %19 = tpu.matmul %17, %6, %cst_9 {dimension_numbers = #tpu.dot_dimension_numbers<[1], [0], [0], [1], [0, 0, 1, 1], [], []>} : vector<8x64xf32>, vector<64x64xf32>, vector<8x64xf32> -> vector<8x64xf32>
    %20 = arith.addf %18, %19 : vector<8x64xf32>
    %21 = math.tanh %20 : vector<8x64xf32>
    %22 = vector.extract_strided_slice %5 {offsets = [24, 0], sizes = [8, 64], strides = [1, 1]} : vector<72x64xf32> to vector<8x64xf32>
    %cst_10 = arith.constant dense<0.000000e+00> : vector<8x64xf32>
    %23 = tpu.matmul %21, %6, %cst_10 {dimension_numbers = #tpu.dot_dimension_numbers<[1], [0], [0], [1], [0, 0, 1, 1], [], []>} : vector<8x64xf32>, vector<64x64xf32>, vector<8x64xf32> -> vector<8x64xf32>
    %24 = arith.addf %22, %23 : vector<8x64xf32>
    %25 = math.tanh %24 : vector<8x64xf32>
    %26 = vector.extract_strided_slice %5 {offsets = [32, 0], sizes = [8, 64], strides = [1, 1]} : vector<72x64xf32> to vector<8x64xf32>
    %cst_11 = arith.constant dense<0.000000e+00> : vector<8x64xf32>
    %27 = tpu.matmul %25, %6, %cst_11 {dimension_numbers = #tpu.dot_dimension_numbers<[1], [0], [0], [1], [0, 0, 1, 1], [], []>} : vector<8x64xf32>, vector<64x64xf32>, vector<8x64xf32> -> vector<8x64xf32>
    %28 = arith.addf %26, %27 : vector<8x64xf32>
    %29 = math.tanh %28 : vector<8x64xf32>
    %30 = vector.extract_strided_slice %5 {offsets = [40, 0], sizes = [8, 64], strides = [1, 1]} : vector<72x64xf32> to vector<8x64xf32>
    %cst_12 = arith.constant dense<0.000000e+00> : vector<8x64xf32>
    %31 = tpu.matmul %29, %6, %cst_12 {dimension_numbers = #tpu.dot_dimension_numbers<[1], [0], [0], [1], [0, 0, 1, 1], [], []>} : vector<8x64xf32>, vector<64x64xf32>, vector<8x64xf32> -> vector<8x64xf32>
    %32 = arith.addf %30, %31 : vector<8x64xf32>
    %33 = math.tanh %32 : vector<8x64xf32>
    %34 = vector.extract_strided_slice %5 {offsets = [48, 0], sizes = [8, 64], strides = [1, 1]} : vector<72x64xf32> to vector<8x64xf32>
    %cst_13 = arith.constant dense<0.000000e+00> : vector<8x64xf32>
    %35 = tpu.matmul %33, %6, %cst_13 {dimension_numbers = #tpu.dot_dimension_numbers<[1], [0], [0], [1], [0, 0, 1, 1], [], []>} : vector<8x64xf32>, vector<64x64xf32>, vector<8x64xf32> -> vector<8x64xf32>
    %36 = arith.addf %34, %35 : vector<8x64xf32>
    %37 = math.tanh %36 : vector<8x64xf32>
    %38 = vector.extract_strided_slice %5 {offsets = [56, 0], sizes = [8, 64], strides = [1, 1]} : vector<72x64xf32> to vector<8x64xf32>
    %cst_14 = arith.constant dense<0.000000e+00> : vector<8x64xf32>
    %39 = tpu.matmul %37, %6, %cst_14 {dimension_numbers = #tpu.dot_dimension_numbers<[1], [0], [0], [1], [0, 0, 1, 1], [], []>} : vector<8x64xf32>, vector<64x64xf32>, vector<8x64xf32> -> vector<8x64xf32>
    %40 = arith.addf %38, %39 : vector<8x64xf32>
    %41 = math.tanh %40 : vector<8x64xf32>
    %42 = vector.extract_strided_slice %5 {offsets = [64, 0], sizes = [8, 64], strides = [1, 1]} : vector<72x64xf32> to vector<8x64xf32>
    %cst_15 = arith.constant dense<0.000000e+00> : vector<8x64xf32>
    %43 = tpu.matmul %41, %6, %cst_15 {dimension_numbers = #tpu.dot_dimension_numbers<[1], [0], [0], [1], [0, 0, 1, 1], [], []>} : vector<8x64xf32>, vector<64x64xf32>, vector<8x64xf32> -> vector<8x64xf32>
    %44 = arith.addf %42, %43 : vector<8x64xf32>
    %45 = math.tanh %44 : vector<8x64xf32>
    %c0_16 = arith.constant 0 : index
    %c0_17 = arith.constant 0 : index
    %46 = vector.load %arg4[%c0_16, %c0_17] : memref<64x128xf32, #tpu.memory_space<vmem>>, vector<64x128xf32>
    %cst_18 = arith.constant dense<0.000000e+00> : vector<8x128xf32>
    %47 = tpu.matmul %45, %46, %cst_18 {dimension_numbers = #tpu.dot_dimension_numbers<[1], [0], [0], [1], [0, 0, 1, 1], [], []>} : vector<8x64xf32>, vector<64x128xf32>, vector<8x128xf32> -> vector<8x128xf32>
    %c0_19 = arith.constant 0 : index
    %c0_20 = arith.constant 0 : index
    %48 = vector.load %arg5[%c0_19, %c0_20] : memref<1x128xf32, #tpu.memory_space<vmem>>, vector<1x128xf32>
    %49 = vector.broadcast %48 : vector<1x128xf32> to vector<8x128xf32>
    %50 = arith.addf %47, %49 : vector<8x128xf32>
    %c0_21 = arith.constant 0 : index
    %c0_22 = arith.constant 0 : index
    %51 = vector.load %arg6[%c0_21, %c0_22] : memref<8x128xf32, #tpu.memory_space<vmem>>, vector<8x128xf32>
    tpu.vector_store %arg6[%c0_21, %c0_22], %50 {strides = array<i32>} : memref<8x128xf32, #tpu.memory_space<vmem>>, vector<8x128xf32>,
    return
  }
}

</mosaic_0001>

<bundles_post_ra>
// kernel: rnn_forward.1
= control target key start
LH: loop header
LB: loop body
LE: loop exit
PB: predicated region body
PF: predicated region fallthrough
CT: control target
= control target key end

     0   :  { %11 = vsyncpa [#allocation3], 0  ;;  %s1387_s21 = smov [#allocation2]   ;;  %s1676_s0 = inlined_call_operand.vmem [shape: f32[72,4], index: 0, kind: input, shape index: {}]   ;;  %s1677_s1 = inlined_call_operand.hbm [shape: f32[4,64], index: 1, kind: input, shape index: {}]   ;;  %s1678_s2 = inlined_call_operand.vmem [shape: f32[1,64], index: 2, kind: input, shape index: {}]   ;;  %s1679_s3 = inlined_call_operand.vmem [shape: f32[64,64], index: 3, kind: input, shape index: {}]   ;;  %s1680_s4 = inlined_call_operand.vmem [shape: f32[64,128], index: 4, kind: input, shape index: {}]   ;;  %s1681_s5 = inlined_call_operand.vmem [shape: f32[1,128], index: 5, kind: input, shape index: {}]   ;;  %s1682_s6 = inlined_call_operand.vmem [shape: f32[8,128], index: 6, kind: output, shape index: {}]  }
   0x1   :  { %s20_s22 = sshll.u32 %s1387_s21, 4  ;;  %s1363_s25 = scalar_lea.hbm %s1677_s1, 64  ;;  %s21_s22 = int_to_ptr.vmem [resolvable:$true] %s20_s22 }
   0x2   :  { %p1364_p0 = scmp.ne.s32.totalorder %s1677_s1, %s1363_s25  ;;  %p1367_p1 = scmp.lt.u32.totalorder %s1363_s25, %s1677_s1 }
   0x4   :  { %p1369_p2 = pnand %p1367_p1, %p1364_p0 }
   0x6   :  { %1372 = shalt.err (!%p1369_p2)
}
   0x7   :  { %s1373_s30 = scalar_lea.vmem %s21_s22, 64  ;;  %p1378_p4 = scmp.lt.s32.totalorder %s21_s22, %s21_s22 }
   0x8   :  { %p1374_p3 = scmp.ne.s32.totalorder %s21_s22, %s1373_s30  ;;  %p1379_p5 = scmp.lt.s32.totalorder %s1373_s30, %s1373_s30 }
   0xa   :  { %p1380_p6 = por %p1379_p5, %p1378_p4 }
   0xc   :  { %p1381_p7 = pnand %p1380_p6, %p1374_p3 }
   0xe   :  { %1384 = shalt.err (!%p1381_p7)
}
   0xf   :  { %23 = dma.hbm_to_vmem [thread:$0]  %s1677_s1, 64, %s21_s22, [#allocation3]  }
  0x10   :  { %1385 = dma.done.wait [#allocation3], 64  }
  0x11   :  { %1386 = vsyncadd [#allocation3], 4294967232  ;;  %v1388_v0 = vmov 0.0   ;;  %vm1389_vm0 = vmmov 0   ;;  %v1390_v1 = vmov 0.0|0.0   ;;  %vm80_vm1 = vcmask 1043456  }
  0x12   :  { %1014 = vmatprep.subr.mxu1 %v1388_v0  ;;  %1016 = vmatprep.mubr.msk.f32.mxu1 %vm1389_vm0, %v1388_v0  ;;  %vm52_vm2 = vcmask 31744   ;;  %v44_v2 = vld [vmem:[#allocation2] sm:$0xf]  ;;  %v195_v5 = vld [vmem:[%s1679_s3 + $0x8] sm:$0xff]  ;;  %v196_v7 = vld [vmem:[%s1679_s3 + $0x10] sm:$0xff]  ;;  %v202_v28 = vlaneseq  ;;  %vm207_vm4 = vcmask 523264  }
  0x13   :  { %1250 = vmatprep.subr.bf16.mxu0 %v1390_v1  ;;  %1116 = vmatprep.mubr.msk.f32.mxu0 %vm1389_vm0, %v1388_v0  ;;  %v35_v3 = vld [vmem:[%s1676_s0] sm:$0xff]  ;;  %v197_v8 = vld [vmem:[%s1679_s3 + $0x18] sm:$0xff]  ;;  %v36_v9 = vld [vmem:[%s1676_s0 + $0x8] sm:$0xff] }
  0x14   :  { %v194_v4 = vld [vmem:[%s1679_s3] sm:$0xff]  ;;  %1015 = vmatpush3.msk.msra.mxu1 %vm80_vm1, %v44_v2  ;;  %v1469_v10 = vpack.c.bf16 %v197_v8, %v196_v7  ;;  %v199_v12 = vld [vmem:[%s1679_s3 + $0x28] sm:$0xff]  ;;  %v37_v13 = vld [vmem:[%s1676_s0 + $0x10] sm:$0xff]  ;;  %v203_v29 = vand.u32 127, %v202_v28 }
  0x15   :  { %1017 = vmatmul.mubr.msk.f32.vlgmr.msra.gmra.mrb[0].mxu1 %vm52_vm2, %v35_v3  ;;  %1214 = vmatprep.subr.bf16.mxu1 %v1390_v1  ;;  %v1455_v6 = vpack.c.bf16 %v195_v5, %v194_v4  ;;  %v198_v11 = vld [vmem:[%s1679_s3 + $0x20] sm:$0xff]  ;;  %v38_v15 = vld [vmem:[%s1676_s0 + $0x18] sm:$0xff]  ;;  %v40_v17 = vld [vmem:[%s1676_s0 + $0x28] sm:$0xff] }
  0x16   :  { %1019 = vmatprep.mubr.msk.f32.mxu1 %vm1389_vm0, %v1388_v0  ;;  %v1487_v14 = vpack.c.bf16 %v199_v12, %v198_v11  ;;  %v39_v16 = vld [vmem:[%s1676_s0 + $0x20] sm:$0xff]  ;;  %v41_v18 = vld [vmem:[%s1676_s0 + $0x30] sm:$0xff]  ;;  %v42_v19 = vld [vmem:[%s1676_s0 + $0x38] sm:$0xff]  ;;  %vm204_vm3 = vcmp.lt.s32.totalorder %v203_v29, 32 }
  0x17   :  { %1216 = vmatpush3.bf16.msra.mxu1 %v1455_v6  ;;  %1252 = vmatpush3.bf16.msra.mxu0 %v1455_v6  ;;  %v200_v20 = vld [vmem:[%s1679_s3 + $0x30] sm:$0xff]  ;;  %v201_v21 = vld [vmem:[%s1679_s3 + $0x38] sm:$0xff]  ;;  %v43_v23 = vld [vmem:[%s1676_s0 + $0x40] sm:$0xff] }
  0x18   :  { %1217 = vmatprep.subr.bf16.mxu1 %v1390_v1  ;;  %1253 = vmatprep.subr.bf16.mxu0 %v1390_v1  ;;  %v1532_v22 = vpack.c.bf16 %v201_v21, %v200_v20  ;;  %v1550_v24 = vld [vmem:[%s1678_s2] ss:$0 sm:$0xff]  ;;  %v814_v20 = vld [vmem:[%s1680_s4 + $0x30] sm:$0xff]  ;;  %v815_v21 = vld [vmem:[%s1680_s4 + $0x38] sm:$0xff] }
  0x19   :  { %1020 = vmatmul.mubr.msk.f32.gmra.mrb[2].mxu1 %vm52_vm2, %v36_v9  ;;  %v808_v8 = vld [vmem:[%s1680_s4] sm:$0xff] }
  0x1a   :  { %1022 = vmatprep.mubr.msk.f32.mxu1 %vm1389_vm0, %v1388_v0  ;;  %v921_v29 = vld [vmem:[%s1681_s5] ss:$0 sm:$0xff] }
  0x1b   :  { %1219 = vmatpush3.bf16.msra.mxu1 %v1469_v10  ;;  %1255 = vmatpush3.bf16.msra.mxu0 %v1469_v10 }
  0x1c   :  { %1220 = vmatprep.subr.bf16.mxu1 %v1390_v1  ;;  %1256 = vmatprep.subr.bf16.mxu0 %v1390_v1 }
  0x1d   :  { %1023 = vmatmul.mubr.msk.f32.gmra.mrb[4].mxu1 %vm52_vm2, %v37_v13 }
  0x1e   :  { %1025 = vmatprep.mubr.msk.f32.mxu1 %vm1389_vm0, %v1388_v0 }
  0x1f   :  { %1222 = vmatpush3.bf16.msra.mxu1 %v1487_v14  ;;  %1258 = vmatpush3.bf16.msra.mxu0 %v1487_v14 }
  0x20   :  { %1223 = vmatprep.subr.bf16.mxu1 %v1390_v1  ;;  %1259 = vmatprep.subr.bf16.mxu0 %v1390_v1 }
  0x21   :  { %1026 = vmatmul.mubr.msk.f32.gmra.mrb[6].mxu1 %vm52_vm2, %v38_v15  ;;  %v811_v15 = vld [vmem:[%s1680_s4 + $0x18] sm:$0xff] }
  0x22   :  { %1028 = vmatprep.mubr.msk.f32.mxu1 %vm1389_vm0, %v1388_v0 }
  0x23   :  { %1261 = vmatpush3.bf16.msra.mxu0 %v1532_v22  ;;  %1225 = vmatpush3.bf16.msra.mxu1 %v1532_v22 }
  0x24   :  { %1226 = vmatprep.subr.bf16.mxu1 %v1390_v1  ;;  %1262 = vmatprep.subr.bf16.mxu0 %v1390_v1 }
  0x25   :  { %1029 = vmatmul.mubr.msk.f32.gmra.mrb[8].mxu1 %vm52_vm2, %v39_v16 }
  0x26   :  { %1031 = vmatprep.mubr.msk.f32.mxu1 %vm1389_vm0, %v1388_v0 }
  0x29   :  { %1032 = vmatmul.mubr.msk.f32.gmra.mrb[10].mxu1 %vm52_vm2, %v40_v17  ;;  %v812_v17 = vld [vmem:[%s1680_s4 + $0x20] sm:$0xff] }
  0x2a   :  { %1034 = vmatprep.mubr.msk.f32.mxu1 %vm1389_vm0, %v1388_v0 }
  0x2d   :  { %1035 = vmatmul.mubr.msk.f32.gmra.mrb[12].mxu1 %vm52_vm2, %v41_v18  ;;  %v813_v18 = vld [vmem:[%s1680_s4 + $0x28] sm:$0xff] }
  0x2e   :  { %1037 = vmatprep.mubr.msk.f32.mxu1 %vm1389_vm0, %v1388_v0 }
  0x31   :  { %1038 = vmatmul.mubr.msk.f32.gmra.mrb[14].mxu1 %vm52_vm2, %v42_v19  ;;  %v1317_v19 = vpack.c.bf16 %v813_v18, %v812_v17 }
  0x32   :  { %1040 = vmatprep.mubr.msk.f32.mxu1 %vm1389_vm0, %v1388_v0 }
  0x35   :  { %1041 = vmatmul.mubr.msk.f32.gmra.mrb[16].mxu1 %vm52_vm2, %v43_v23 }
  0x36   :  { %1059 = vmatprep.mubr.msk.f32.mxu1 %vm1389_vm0, %v1388_v0 }
  0xe8   :  { %v150_v25 = vpop.f32.mrb[0].mxu1 }
  0xe9   :  { %v151_v26 = vadd.f32 %v1550_v24, %v150_v25  ;;  %v1018_v27 = vpop.f32.mrb[1].mxu1 }
  0xeb   :  { %1345 = vtanh.f32 %v151_v26 }
  0xf5   :  { %v1346_v30 = vpop.eup %1345 }
  0xf6   :  { %v206_v31 = vsel %vm204_vm3, %v1346_v30, 0.0 }
  0xf7   :  { %1060 = vmatmul.mubr.msk.f32.vlgmr.msra.gmra.mrb[2].mxu1 %vm207_vm4, %v206_v31 }
  0xf8   :  { %v170_v32 = vpop.f32.mrb[8].mxu1  ;;  %1228 = vmatpush3.bf16.msra.mxu1 %v1455_v6  ;;  %1078 = vmatprep.mubr.msk.f32.mxu1 %vm1389_vm0, %v1388_v0 }
  0xf9   :  { %v1030_v33 = vpop.f32.mrb[9].mxu1  ;;  %1229 = vmatprep.subr.bf16.mxu1 %v1390_v1  ;;  %v171_v54 = vadd.f32 %v1550_v24, %v170_v32 }
  0xfc   :  { %v1558_v34 = vpop.f32.mrb[10].mxu1  ;;  %1231 = vmatpush3.bf16.msra.mxu1 %v1469_v10 }
  0xfd   :  { %v1033_v35 = vpop.f32.mrb[11].mxu1  ;;  %1232 = vmatprep.subr.bf16.mxu1 %v1390_v1  ;;  %v176_v59 = vadd.f32 %v1550_v24, %v1558_v34 }
 0x100   :  { %1234 = vmatpush3.bf16.msra.mxu1 %v1487_v14  ;;  %v1566_v36 = vpop.f32.mrb[12].mxu1 }
 0x101   :  { %1235 = vmatprep.subr.bf16.mxu1 %v1390_v1  ;;  %v1036_v37 = vpop.f32.mrb[13].mxu1  ;;  %v181_v2 = vadd.f32 %v1550_v24, %v1566_v36 }
 0x104   :  { %1237 = vmatpush3.bf16.msra.mxu1 %v1532_v22  ;;  %v1568_v38 = vpop.f32.mrb[14].mxu1 }
 0x105   :  { %1238 = vmatprep.subr.bf16.mxu1 %v1390_v1  ;;  %v1039_v39 = vpop.f32.mrb[15].mxu1  ;;  %v186_v9 = vadd.f32 %v1550_v24, %v1568_v38 }
 0x108   :  { %v1570_v40 = vpop.f32.mrb[16].mxu1 }
 0x109   :  { %v1042_v41 = vpop.f32.mrb[17].mxu1  ;;  %v191_v23 = vadd.f32 %v1550_v24, %v1570_v40 }
 0x1ca   :  { %v277_v42 = vpop.f32.mrb[2].mxu1 }
 0x1cb   :  { %v1322_v43 = vadd.f32 %v1550_v24, %v277_v42  ;;  %v1061_v44 = vpop.f32.mrb[3].mxu1 }
 0x1cd   :  { %1347 = vtanh.f32 %v1322_v43 }
 0x1d7   :  { %v1348_v45 = vpop.eup %1347 }
 0x1d8   :  { %1079 = vmatmul.mubr.msk.f32.vlgmr.msra.gmra.mrb[4].mxu1 %vm207_vm4, %v1348_v45 }
 0x1d9   :  { %1240 = vmatpush3.bf16.msra.mxu1 %v1455_v6  ;;  %1097 = vmatprep.mubr.msk.f32.mxu1 %vm1389_vm0, %v1388_v0 }
 0x1da   :  { %1241 = vmatprep.subr.bf16.mxu1 %v1390_v1 }
 0x1dd   :  { %1243 = vmatpush3.bf16.msra.mxu1 %v1469_v10 }
 0x1de   :  { %1244 = vmatprep.subr.bf16.mxu1 %v1390_v1 }
 0x1e1   :  { %1246 = vmatpush3.bf16.msra.mxu1 %v1487_v14 }
 0x1e2   :  { %1247 = vmatprep.subr.bf16.mxu1 %v1390_v1 }
 0x1e5   :  { %1249 = vmatpush3.bf16.msra.mxu1 %v1532_v22 }
 0x1e6   :  { %1310 = vmatprep.subr.bf16.mxu1 %v1390_v1 }
 0x2ab   :  { %v352_v46 = vpop.f32.mrb[4].mxu1 }
 0x2ac   :  { %v1323_v47 = vadd.f32 %v1550_v24, %v352_v46  ;;  %v1080_v48 = vpop.f32.mrb[5].mxu1 }
 0x2ae   :  { %1349 = vtanh.f32 %v1323_v47 }
 0x2b8   :  { %v1350_v49 = vpop.eup %1349 }
 0x2b9   :  { %1098 = vmatmul.mubr.msk.f32.vlgmr.msra.gmra.mrb[6].mxu1 %vm207_vm4, %v1350_v49 }
 0x2ba   :  { %1211 = vmatprep.mubr.msk.f32.mxu1 %vm1389_vm0, %v1388_v0 }
 0x38c   :  { %v427_v50 = vpop.f32.mrb[6].mxu1 }
 0x38d   :  { %v1324_v51 = vadd.f32 %v1550_v24, %v427_v50  ;;  %v1099_v52 = vpop.f32.mrb[7].mxu1 }
 0x38f   :  { %1351 = vtanh.f32 %v1324_v51 }
 0x399   :  { %v1352_v53 = vpop.eup %1351 }
 0x39a   :  { %1117 = vmatmul.mubr.msk.f32.vlgmr.msra.gmra.mrb[0].mxu0 %vm207_vm4, %v1352_v53 }
 0x39b   :  { %1264 = vmatpush3.bf16.msra.mxu0 %v1455_v6  ;;  %1135 = vmatprep.mubr.msk.f32.mxu0 %vm1389_vm0, %v1388_v0 }
 0x39c   :  { %1265 = vmatprep.subr.bf16.mxu0 %v1390_v1 }
 0x39f   :  { %1267 = vmatpush3.bf16.msra.mxu0 %v1469_v10 }
 0x3a0   :  { %1268 = vmatprep.subr.bf16.mxu0 %v1390_v1 }
 0x3a3   :  { %1270 = vmatpush3.bf16.msra.mxu0 %v1487_v14 }
 0x3a4   :  { %1271 = vmatprep.subr.bf16.mxu0 %v1390_v1 }
 0x3a7   :  { %1273 = vmatpush3.bf16.msra.mxu0 %v1532_v22 }
 0x3a8   :  { %1274 = vmatprep.subr.bf16.mxu0 %v1390_v1 }
 0x46d   :  { %v502_v55 = vpop.f32.mrb[0].mxu0 }
 0x46e   :  { %v506_v56 = vadd.f32 %v502_v55, %v171_v54  ;;  %v1118_v57 = vpop.f32.mrb[1].mxu0 }
 0x470   :  { %1353 = vtanh.f32 %v506_v56 }
 0x47a   :  { %v1354_v58 = vpop.eup %1353 }
 0x47b   :  { %1136 = vmatmul.mubr.msk.f32.vlgmr.msra.gmra.mrb[2].mxu0 %vm207_vm4, %v1354_v58 }
 0x47c   :  { %1276 = vmatpush3.bf16.msra.mxu0 %v1455_v6  ;;  %1154 = vmatprep.mubr.msk.f32.mxu0 %vm1389_vm0, %v1388_v0 }
 0x47d   :  { %1277 = vmatprep.subr.bf16.mxu0 %v1390_v1 }
 0x480   :  { %1279 = vmatpush3.bf16.msra.mxu0 %v1469_v10 }
 0x481   :  { %1280 = vmatprep.subr.bf16.mxu0 %v1390_v1 }
 0x484   :  { %1282 = vmatpush3.bf16.msra.mxu0 %v1487_v14 }
 0x485   :  { %1283 = vmatprep.subr.bf16.mxu0 %v1390_v1 }
 0x488   :  { %1285 = vmatpush3.bf16.msra.mxu0 %v1532_v22 }
 0x489   :  { %1286 = vmatprep.subr.bf16.mxu0 %v1390_v1 }
 0x54e   :  { %v577_v60 = vpop.f32.mrb[2].mxu0 }
 0x54f   :  { %v581_v61 = vadd.f32 %v577_v60, %v176_v59  ;;  %v1137_v62 = vpop.f32.mrb[3].mxu0 }
 0x551   :  { %1355 = vtanh.f32 %v581_v61 }
 0x55b   :  { %v1356_v63 = vpop.eup %1355 }
 0x55c   :  { %1155 = vmatmul.mubr.msk.f32.vlgmr.msra.gmra.mrb[4].mxu0 %vm207_vm4, %v1356_v63 }
 0x55d   :  { %1288 = vmatpush3.bf16.msra.mxu0 %v1455_v6  ;;  %1173 = vmatprep.mubr.msk.f32.mxu0 %vm1389_vm0, %v1388_v0 }
 0x55e   :  { %1289 = vmatprep.subr.bf16.mxu0 %v1390_v1 }
 0x561   :  { %1291 = vmatpush3.bf16.msra.mxu0 %v1469_v10 }
 0x562   :  { %1292 = vmatprep.subr.bf16.mxu0 %v1390_v1 }
 0x565   :  { %1294 = vmatpush3.bf16.msra.mxu0 %v1487_v14 }
 0x566   :  { %1295 = vmatprep.subr.bf16.mxu0 %v1390_v1 }
 0x569   :  { %1297 = vmatpush3.bf16.msra.mxu0 %v1532_v22 }
 0x56a   :  { %1298 = vmatprep.subr.bf16.mxu0 %v1390_v1 }
 0x62f   :  { %v652_v3 = vpop.f32.mrb[4].mxu0 }
 0x630   :  { %v656_v4 = vadd.f32 %v652_v3, %v181_v2  ;;  %v1156_v5 = vpop.f32.mrb[5].mxu0 }
 0x632   :  { %1357 = vtanh.f32 %v656_v4 }
 0x63c   :  { %v1358_v7 = vpop.eup %1357 }
 0x63d   :  { %1174 = vmatmul.mubr.msk.f32.vlgmr.msra.gmra.mrb[6].mxu0 %vm207_vm4, %v1358_v7 }
 0x63e   :  { %1300 = vmatpush3.bf16.msra.mxu0 %v1455_v6  ;;  %1192 = vmatprep.mubr.msk.f32.mxu0 %vm1389_vm0, %v1388_v0  ;;  %v809_v0 = vld [vmem:[%s1680_s4 + $0x8] sm:$0xff] }
 0x63f   :  { %1301 = vmatprep.subr.bf16.mxu0 %v1390_v1  ;;  %v1311_v6 = vpack.c.bf16 %v809_v0, %v808_v8 }
 0x641   :  { %1312 = vmatpush3.bf16.msra.mxu1 %v1311_v6 }
 0x642   :  { %1303 = vmatpush3.bf16.msra.mxu0 %v1469_v10  ;;  %1313 = vmatprep.subr.bf16.mxu1 %v1390_v1 }
 0x643   :  { %1304 = vmatprep.subr.bf16.mxu0 %v1390_v1 }
 0x646   :  { %1306 = vmatpush3.bf16.msra.mxu0 %v1487_v14  ;;  %v810_v14 = vld [vmem:[%s1680_s4 + $0x10] sm:$0xff] }
 0x647   :  { %1307 = vmatprep.subr.bf16.mxu0 %v1390_v1  ;;  %v1314_v16 = vpack.c.bf16 %v811_v15, %v810_v14 }
 0x649   :  { %1315 = vmatpush3.bf16.msra.mxu1 %v1314_v16 }
 0x64a   :  { %1309 = vmatpush3.bf16.msra.mxu0 %v1532_v22  ;;  %1316 = vmatprep.subr.bf16.mxu1 %v1390_v1  ;;  %v1320_v22 = vpack.c.bf16 %v815_v21, %v814_v20 }
 0x64d   :  { %1318 = vmatpush3.bf16.msra.mxu1 %v1317_v19 }
 0x64e   :  { %1319 = vmatprep.subr.bf16.mxu1 %v1390_v1 }
 0x651   :  { %1321 = vmatpush3.bf16.msra.mxu1 %v1320_v22 }
 0x710   :  { %v727_v10 = vpop.f32.mrb[6].mxu0 }
 0x711   :  { %v731_v11 = vadd.f32 %v727_v10, %v186_v9  ;;  %v1175_v12 = vpop.f32.mrb[7].mxu0 }
 0x713   :  { %1359 = vtanh.f32 %v731_v11 }
 0x71d   :  { %v1360_v13 = vpop.eup %1359 }
 0x71e   :  { %1193 = vmatmul.mubr.msk.f32.vlgmr.msra.gmra.mrb[8].mxu0 %vm207_vm4, %v1360_v13 }
 0x7f1   :  { %v802_v25 = vpop.f32.mrb[8].mxu0 }
 0x7f2   :  { %v806_v26 = vadd.f32 %v802_v25, %v191_v23  ;;  %v1194_v27 = vpop.f32.mrb[9].mxu0 }
 0x7f4   :  { %1361 = vtanh.f32 %v806_v26 }
 0x7fe   :  { %v1362_v28 = vpop.eup %1361 }
 0x7ff   :  { %1212 = vmatmul.mubr.msk.f32.vlgmr.msra.gmra.mrb[18].mxu1 %vm207_vm4, %v1362_v28 }
 0x8d2   :  { %v892_v30 = vpop.f32.mrb[18].mxu1 }
 0x8d3   :  { %v893_v31 = vadd.f32 %v921_v29, %v892_v30  ;;  %v1213_v32 = vpop.f32.mrb[19].mxu1 }
 0x8d5   :  { %896 = vst [vmem:[%s1682_s6] sm:$0xff] %v893_v31 }
 0x8d6   :  { %901 = vsyncpa [#allocation3], 1 }

</bundles_post_ra>
